<compile_context>
chip_gen: v5e
topology: v5e:2x2
jax: 0.10.0
libtpu: 0.0.40
codegen_flags: <defaults>
</compile_context>

<pallas_src>
import numpy as np
import jax
import jax.numpy as jnp
from jax import lax
from jax.experimental import pallas as pl
from jax.experimental.pallas import tpu as pltpu


def _num_tensorcores():
    """Best-effort detection of TensorCores per chip (v7x has 2)."""
    try:
        kind = jax.devices()[0].device_kind.lower()
        if "v7" in kind:
            return 2
    except Exception:
        pass
    return 1


def _sublane_align(itemsize):
    """Row-tile alignment that respects sublane packing for the dtype."""
    if itemsize >= 4:
        return 8
    if itemsize == 2:
        return 16
    return 32


def _choose_block_rows(R, D, in_bytes, num_cores):
    """Row-tile size from a per-step byte budget (not a fixed row cap)."""
    align = _sublane_align(in_bytes)

    # Target bytes of *input* moved per grid step (amortizes ~0.35us/step):
    #   single-TC v5e/v6e: ~4 MiB; v7x (64 MiB VMEM, 2 TCs): ~3 MiB.
    target_in_bytes = (3 << 20) if num_cores >= 2 else (4 << 20)

    row_bytes = max(1, D * in_bytes)
    br = max(align, (target_in_bytes // row_bytes))
    br = max(align, (br // align) * align)

    # Never exceed the (alignment-rounded) total row count.
    r_aligned = ((R + align - 1) // align) * align
    br = min(br, r_aligned)

    # On 2-TC parts, aim for >=4 grid steps so both cores get pipelined blocks.
    if num_cores >= 2:
        while br > align and pl.cdiv(R, br) < 4:
            br = max(align, ((br // 2) // align) * align)
    return br


def layer_norm(x, gamma, beta, *, eps=1e-5):
    """Pallas TPU LayerNorm over the last dimension of `x`.

    Matches torch.nn.functional.layer_norm(x, x.shape[-1:], gamma, beta).
    """
    orig_shape = x.shape
    D = orig_shape[-1]
    R = int(np.prod(orig_shape[:-1])) if len(orig_shape) > 1 else 1

    # Native dtype all the way to the kernel: no wrapper upcast, no pad.
    x2 = x.reshape(R, D)
    in_bytes = x2.dtype.itemsize
    out_bytes = in_bytes

    # Pack per-feature params into one lane-dense, grid-resident (2, D) operand.
    gb = jnp.stack(
        [jnp.asarray(gamma, jnp.float32).reshape(D),
         jnp.asarray(beta, jnp.float32).reshape(D)], axis=0)

    num_cores = _num_tensorcores()
    br = _choose_block_rows(R, D, in_bytes, num_cores)
    grid = (pl.cdiv(R, br),)  # ragged last block OK: rows independent, OOB writes masked

    # Pipeline VMEM footprint: 2x input block + 2x output block
    # + ~2 block-sized f32 temporaries (xv, xc) + the small (2, D) gb buffers.
    blk = br * D
    footprint = (2 * blk * in_bytes + 2 * blk * out_bytes + 2 * blk * 4
                 + 2 * 2 * D * 4)
    vmem_cap = (40 << 20) if num_cores >= 2 else (80 << 20)  # v7x VMEM is 64 MiB
    vmem_limit = int(min(vmem_cap, max(32 << 20, int(footprint * 1.5) + (1 << 20))))

    inv_d = np.float32(1.0 / D)

    def kernel(x_ref, gb_ref, o_ref):
        xv = x_ref[...].astype(jnp.float32)               # native-dtype DMA, f32 compute
        mean = jnp.sum(xv, axis=-1, keepdims=True) * inv_d
        xc = xv - mean
        var = jnp.sum(xc * xc, axis=-1, keepdims=True) * inv_d   # centered two-pass
        inv = lax.rsqrt(var + eps)                        # EUP
        g = gb_ref[0:1, :]                                # (1, D)
        b = gb_ref[1:2, :]                                # (1, D)
        o_ref[...] = (xc * inv * g + b).astype(o_ref.dtype)

    out = pl.pallas_call(
        kernel,
        out_shape=jax.ShapeDtypeStruct((R, D), x.dtype),
        grid_spec=pltpu.PrefetchScalarGridSpec(
            num_scalar_prefetch=0,
            grid=grid,
            in_specs=[
                pl.BlockSpec((br, D), lambda i: (i, 0)),
                pl.BlockSpec((2, D), lambda i: (0, 0)),   # resident across grid
            ],
            out_specs=pl.BlockSpec((br, D), lambda i: (i, 0)),
        ),
        compiler_params=pltpu.CompilerParams(
            dimension_semantics=("parallel",),
            vmem_limit_bytes=vmem_limit),
    )(x2, gb)

    return out.reshape(orig_shape)


# ----------------------------- pure-JAX reference -----------------------------

def _reference(x, gamma, beta, eps=1e-5):
    xf = x.astype(jnp.float32)
    mean = xf.mean(axis=-1, keepdims=True)
    var = xf.var(axis=-1, keepdims=True)          # population variance (ddof=0)
    y = (xf - mean) / jnp.sqrt(var + eps)
    return (y * gamma + beta).astype(x.dtype)


# ----------------------------- main -----------------------------

if __name__ == "__main__":
    B, S, D = 2, 8, 32

    key = jax.random.PRNGKey(0)
    kx, kg = jax.random.split(key)

    x = jax.random.normal(kx, (B, S, D), jnp.float32)
    gamma = 1.0 + 0.1 * jax.random.normal(kg, (D,), jnp.float32)  # nn.Parameter
    beta = jnp.zeros((D,), jnp.float32)                           # registered buffer

    # f32 path
    out = layer_norm(x, gamma, beta)
    out = jax.block_until_ready(out)
    assert out.shape == (B, S, D)
    ref = _reference(x, gamma, beta)
    np.testing.assert_allclose(np.asarray(out), np.asarray(ref),
                               rtol=2e-5, atol=2e-5)

    # bf16 path (exercises the in-kernel dtype cast; looser tolerance)
    xb = x.astype(jnp.bfloat16)
    outb = jax.block_until_ready(layer_norm(xb, gamma, beta))
    refb = _reference(xb, gamma, beta)
    np.testing.assert_allclose(np.asarray(jnp.asarray(outb, jnp.float32)),
                               np.asarray(jnp.asarray(refb, jnp.float32)),
                               rtol=5e-2, atol=5e-2)

    print("KERNEL_OK")
</pallas_src>

<mosaic_0001>
module attributes {stable_mosaic.version = 11 : i64} {
  func.func @kernel(%arg0: i32, %arg1: memref<16x32xf32, #tpu.memory_space<vmem>>, %arg2: memref<2x32xf32, #tpu.memory_space<vmem>>, %arg3: memref<16x32xf32, #tpu.memory_space<vmem>>) attributes {dimension_semantics = [#tpu.dimension_semantics<parallel>], iteration_bounds = array<i64: 1>, scalar_prefetch = 0 : i64, scratch_operands = 0 : i64, tpu.core_type = #tpu.core_type<tc>, window_params = [{transform_indices = @transform_0, window_bounds = array<i64: 16, 32>}, {pipeline_mode = #tpu.pipeline_mode<synchronous>, transform_indices = @transform_1, window_bounds = array<i64: 2, 32>}, {transform_indices = @transform_2, window_bounds = array<i64: 16, 32>}]} {
    %c0 = arith.constant 0 : index
    %c0_0 = arith.constant 0 : index
    %0 = vector.load %arg1[%c0, %c0_0] : memref<16x32xf32, #tpu.memory_space<vmem>>, vector<16x32xf32>
    %cst = arith.constant dense<0.000000e+00> : vector<16xf32>
    %1 = vector.multi_reduction <add>, %0, %cst [1] : vector<16x32xf32> to vector<16xf32>
    %2 = vector.shape_cast %1 : vector<16xf32> to vector<16x1xf32>
    %cst_1 = arith.constant 3.125000e-02 : f32
    %3 = vector.broadcast %cst_1 : f32 to vector<16x1xf32>
    %4 = arith.mulf %2, %3 : vector<16x1xf32>
    %5 = vector.broadcast %4 : vector<16x1xf32> to vector<16x32xf32>
    %6 = arith.subf %0, %5 : vector<16x32xf32>
    %7 = arith.mulf %6, %6 : vector<16x32xf32>
    %cst_2 = arith.constant dense<0.000000e+00> : vector<16xf32>
    %8 = vector.multi_reduction <add>, %7, %cst_2 [1] : vector<16x32xf32> to vector<16xf32>
    %9 = vector.shape_cast %8 : vector<16xf32> to vector<16x1xf32>
    %cst_3 = arith.constant 3.125000e-02 : f32
    %10 = vector.broadcast %cst_3 : f32 to vector<16x1xf32>
    %11 = arith.mulf %9, %10 : vector<16x1xf32>
    %cst_4 = arith.constant 9.99999974E-6 : f32
    %12 = vector.broadcast %cst_4 : f32 to vector<16x1xf32>
    %13 = arith.addf %11, %12 : vector<16x1xf32>
    %14 = math.rsqrt %13 : vector<16x1xf32>
    %c0_5 = arith.constant 0 : index
    %c0_6 = arith.constant 0 : index
    %15 = vector.load %arg2[%c0_5, %c0_6] : memref<2x32xf32, #tpu.memory_space<vmem>>, vector<1x32xf32>
    %c1 = arith.constant 1 : index
    %c0_7 = arith.constant 0 : index
    %16 = vector.load %arg2[%c1, %c0_7] : memref<2x32xf32, #tpu.memory_space<vmem>>, vector<1x32xf32>
    %17 = vector.broadcast %14 : vector<16x1xf32> to vector<16x32xf32>
    %18 = arith.mulf %6, %17 : vector<16x32xf32>
    %19 = vector.broadcast %15 : vector<1x32xf32> to vector<16x32xf32>
    %20 = arith.mulf %18, %19 : vector<16x32xf32>
    %21 = vector.broadcast %16 : vector<1x32xf32> to vector<16x32xf32>
    %22 = arith.addf %20, %21 : vector<16x32xf32>
    %c0_8 = arith.constant 0 : index
    %c0_9 = arith.constant 0 : index
    %23 = vector.load %arg3[%c0_8, %c0_9] : memref<16x32xf32, #tpu.memory_space<vmem>>, vector<16x32xf32>
    tpu.vector_store %arg3[%c0_8, %c0_9], %22 {strides = array<i32>} : memref<16x32xf32, #tpu.memory_space<vmem>>, vector<16x32xf32>,
    return
  }
  func.func @transform_0(%arg0: i32) -> (i32, i32) {
    %c0_i32 = arith.constant 0 : i32
    %c0_i32_0 = arith.constant 0 : i32
    return %arg0, %c0_i32 : i32, i32
  }
  func.func @transform_1(%arg0: i32) -> (i32, i32) {
    %c0_i32 = arith.constant 0 : i32
    %c0_i32_0 = arith.constant 0 : i32
    %c0_i32_1 = arith.constant 0 : i32
    return %c0_i32, %c0_i32_0 : i32, i32
  }
  func.func @transform_2(%arg0: i32) -> (i32, i32) {
    %c0_i32 = arith.constant 0 : i32
    %c0_i32_0 = arith.constant 0 : i32
    return %arg0, %c0_i32 : i32, i32
  }
}

</mosaic_0001>

<bundles_post_ra>
// kernel: tpu_custom_call.1
= control target key start
LH: loop header
LB: loop body
LE: loop exit
PB: predicated region body
PF: predicated region fallthrough
CT: control target
= control target key end

     0   :  { %7 = vsyncpa [#allocation3], 0  ;;  %s249_s0 = inlined_call_operand.hbm [shape: f32[16,32], index: 0, kind: input, shape index: {}]   ;;  %s250_s1 = inlined_call_operand.hbm [shape: f32[2,32], index: 1, kind: input, shape index: {}]   ;;  %s251_s2 = inlined_call_operand.hbm [shape: f32[16,32], index: 2, kind: output, shape index: {}]  }
   0x1   :  { %8 = vsyncpa [#allocation6], 0 }
   0x2   :  { %9 = vsyncpa [#allocation4], 0  ;;  %s14_s11 = sshll.u32 %s249_s0, 4  ;;  %s208_s12 = smov [#allocation2]   ;;  %s15_s11 = int_to_ptr.hbm [resolvable:$true] %s14_s11 }
   0x3   :  { %s16_s13 = sshll.u32 %s208_s12, 4  ;;  %s28_s16 = sshll.u32 %s250_s1, 4  ;;  %s17_s13 = int_to_ptr.vmem [resolvable:$true] %s16_s13  ;;  %s29_s16 = int_to_ptr.hbm [resolvable:$true] %s28_s16 }
   0x4   :  { %s209_s17 = smov 128   ;;  %s210_s18 = smov 8  }
   0x5   :  { %22 = dma.hbm_to_vmem [thread:$0]  %s15_s11, 256, %s17_s13, [#allocation3], %s209_s17, %s209_s17, %s210_s18  }
   0x6   :  { %s211_s19 = smov [#allocation5]  }
   0x7   :  { %s30_s20 = sshll.u32 %s211_s19, 4  ;;  %s31_s20 = int_to_ptr.vmem [resolvable:$true] %s30_s20 }
   0x8   :  { %33 = dma.hbm_to_vmem [thread:$0]  %s29_s16, 32, %s31_s20, [#allocation6]  }
   0x9   :  { %202 = dma.done.wait [#allocation3], 256  }
   0xa   :  { %203 = vsyncadd [#allocation3], 4294967040 }
   0xb   :  { %204 = dma.done.wait [#allocation6], 32  }
   0xc   :  { %205 = vsyncadd [#allocation6], 4294967264  ;;  %vm44_vm0 = vcmask 261120   ;;  %v42_v0 = vld [vmem:[#allocation2] sm:$0xff]  ;;  %v43_v2 = vld [vmem:[#allocation2 + $0x8] sm:$0xff]  ;;  %s212_s0 = smov [#allocation7]  }
   0xd   :  { %v45_v1 = vsel %vm44_vm0, %v42_v0, 0.0  ;;  %v48_v3 = vsel %vm44_vm0, %v43_v2, 0.0  ;;  %v124_v28 = vld [vmem:[#allocation5] ss:$0 sm:$0xff]  ;;  %v125_v32 = vld [vmem:[#allocation5 + $0x1] ss:$0 sm:$0xff] }
   0xe   :  { %46 = vadd.xlane.f32.xlu0 %v45_v1  ;;  %s103_s1 = sshll.u32 %s212_s0, 4  ;;  %s105_s23 = sshll.u32 %s251_s2, 4  ;;  %s104_s1 = int_to_ptr.vmem [resolvable:$true] %s103_s1  ;;  %s106_s23 = int_to_ptr.hbm [resolvable:$true] %s105_s23 }
  0x16   :  { %49 = vadd.xlane.f32.xlu0 %v48_v3 }
  0x81   :  { %v47_v4 = vpop.xlane.xlu0 %46 }
  0x82   :  { %v51_v5 = vmul.f32 0.03125, %v47_v4 }
  0x84   :  { %v53_v6 = vsub.f32 %v42_v0, %v51_v5 }
  0x86   :  { %v55_v7 = vmul.f32 %v53_v6, %v53_v6 }
  0x88   :  { %v57_v8 = vsel %vm44_vm0, %v55_v7, 0.0 }
  0x89   :  { %58 = vadd.xlane.f32.xlu1 %v57_v8  ;;  %v50_v9 = vpop.xlane.xlu0 %49 }
  0x8a   :  { %v52_v10 = vmul.f32 0.03125, %v50_v9 }
  0x8c   :  { %v54_v11 = vsub.f32 %v43_v2, %v52_v10 }
  0x8e   :  { %v56_v12 = vmul.f32 %v54_v11, %v54_v11 }
  0x90   :  { %v60_v13 = vsel %vm44_vm0, %v56_v12, 0.0 }
  0x91   :  { %61 = vadd.xlane.f32.xlu1 %v60_v13 }
  0xfc   :  { %v59_v14 = vpop.xlane.xlu1 %58 }
  0xfd   :  { %v63_v15 = vmul.f32 0.03125, %v59_v14 }
  0xff   :  { %v65_v16 = vadd.f32 1e-05, %v63_v15 }
 0x101   :  { %126 = vrsqrt.f32 %v65_v16  ;;  %vm73_vm2 = vweird.f32 %v65_v16 }
 0x104   :  { %v62_v17 = vpop.xlane.xlu1 %61 }
 0x105   :  { %v64_v18 = vmul.f32 0.03125, %v62_v17 }
 0x107   :  { %v127_v19 = vpop.eup %126  ;;  %v66_v20 = vadd.f32 1e-05, %v64_v18 }
 0x108   :  { %v68_v21 = vmul.f32 %v127_v19, %v65_v16  ;;  %vm74_vm1 = vweird.f32 %v127_v19 }
 0x109   :  { %128 = vrsqrt.f32 %v66_v20  ;;  %vm75_vm3 = vmor %vm73_vm2, %vm74_vm1  ;;  %vm83_vm5 = vweird.f32 %v66_v20 }
 0x10a   :  { %v69_v22 = vmul.f32 %v127_v19, %v68_v21 }
 0x10c   :  { %v70_v23 = vmul.f32 0.5, %v69_v22 }
 0x10e   :  { %v71_v24 = vsub.f32 1.5, %v70_v23 }
 0x10f   :  { %v129_v25 = vpop.eup %128 }
 0x110   :  { %v72_v26 = vmul.f32 %v127_v19, %v71_v24  ;;  %v78_v27 = vmul.f32 %v129_v25, %v66_v20  ;;  %vm84_vm4 = vweird.f32 %v129_v25 }
 0x111   :  { %vm85_vm6 = vmor %vm83_vm5, %vm84_vm4 }
 0x112   :  { %v76_v29 = vsel %vm75_vm3, %v127_v19, %v72_v26  ;;  %v79_v30 = vmul.f32 %v129_v25, %v78_v27 }
 0x113   :  { %v89_v31 = vmul.f32 %v76_v29, %v53_v6 }
 0x114   :  { %v80_v33 = vmul.f32 0.5, %v79_v30 }
 0x115   :  { %v92_v34 = vmul.f32 %v124_v28, %v89_v31 }
 0x116   :  { %v81_v35 = vsub.f32 1.5, %v80_v33 }
 0x117   :  { %v95_v36 = vadd.f32 %v125_v32, %v92_v34 }
 0x118   :  { %v82_v37 = vmul.f32 %v129_v25, %v81_v35 }
 0x119   :  { %97 = vst.msk [vmem:[#allocation7] sm:$0xff] %vm44_vm0, %v95_v36 }
 0x11a   :  { %v86_v38 = vsel %vm85_vm6, %v129_v25, %v82_v37 }
 0x11b   :  { %v90_v39 = vmul.f32 %v86_v38, %v54_v11 }
 0x11d   :  { %v93_v40 = vmul.f32 %v124_v28, %v90_v39 }
 0x11f   :  { %v96_v41 = vadd.f32 %v125_v32, %v93_v40 }
 0x121   :  { %98 = vst.msk [vmem:[#allocation7 + $0x8] sm:$0xff] %vm44_vm0, %v96_v41 }
 0x122   :  { %111 = dma.vmem_to_hbm [thread:$0]  %s104_s1, 256, %s106_s23, [#allocation4], %s209_s17, %s209_s17, %s210_s18  }
 0x123   :  { %206 = dma.done.wait [#allocation4], 256  }
 0x124   :  { %207 = vsyncadd [#allocation4], 4294967040 }
 0x125   :  { %116 = vsyncpa [#allocation3], 1 }
 0x126   :  { %117 = vsyncpa [#allocation6], 1 }
 0x127   :  { %118 = vsyncpa [#allocation4], 1 }

</bundles_post_ra>
